<compile_context>
chip_gen: v7x
topology: tpu7x:2x2x1
jax: 0.10.0
libtpu: 0.0.40
codegen_flags: <defaults>
</compile_context>

<pallas_src>
import functools

import numpy as np
import jax
import jax.numpy as jnp
from jax import lax
from jax.experimental import pallas as pl
from jax.experimental.pallas import tpu as pltpu


def _round_up(n, m):
    return ((n + m - 1) // m) * m


# ---------------------------------------------------------------------------
# Bilinear 2x upsample (align_corners=True), grid=(B, C): two tiny MXU matmuls
# per (batch, channel); only (Hout, Hin) / (Win, Wout) operators stay resident.
# ---------------------------------------------------------------------------
def _interp_matrix(n_out, n_in):
    """PyTorch Upsample(bilinear, align_corners=True) interpolation matrix."""
    pos = np.arange(n_out, dtype=np.float64) * (n_in - 1) / (n_out - 1)
    i0 = np.minimum(np.floor(pos).astype(np.int64), n_in - 1)
    i1 = np.minimum(i0 + 1, n_in - 1)
    frac = (pos - i0).astype(np.float32)
    A = np.zeros((n_out, n_in), dtype=np.float32)
    A[np.arange(n_out), i0] += 1.0 - frac
    A[np.arange(n_out), i1] += frac
    return A


def _upsample_kernel(x_ref, ah_ref, awt_ref, o_ref):
    t = jnp.dot(ah_ref[...], x_ref[0, 0], preferred_element_type=jnp.float32)
    o_ref[0, 0] = jnp.dot(t, awt_ref[...], preferred_element_type=jnp.float32)


def bilinear_up2x(x_nchw):
    B, C, Hin, Win = x_nchw.shape
    Hout, Wout = 2 * Hin, 2 * Win
    ah = jnp.asarray(_interp_matrix(Hout, Hin))          # (Hout, Hin)
    awt = jnp.asarray(_interp_matrix(Wout, Win).T)       # (Win, Wout)
    return pl.pallas_call(
        _upsample_kernel,
        out_shape=jax.ShapeDtypeStruct((B, C, Hout, Wout), jnp.float32),
        grid_spec=pltpu.PrefetchScalarGridSpec(
            num_scalar_prefetch=0,
            grid=(B, C),
            in_specs=[
                pl.BlockSpec((1, 1, Hin, Win), lambda b, c: (b, c, 0, 0)),
                pl.BlockSpec((Hout, Hin), lambda b, c: (0, 0)),
                pl.BlockSpec((Win, Wout), lambda b, c: (0, 0)),
            ],
            out_specs=pl.BlockSpec((1, 1, Hout, Wout), lambda b, c: (b, c, 0, 0)),
        ),
        compiler_params=pltpu.CompilerParams(
            dimension_semantics=("parallel", "parallel")),
    )(x_nchw, ah, awt)


# ---------------------------------------------------------------------------
# Fused DeformConv2d(ks=3, padding=0, stride=1, no modulation) + BN + ReLU.
# Grid = (batch, HW-tile); everything computed transposed: (rows, HW) with the
# HW tile on the lane axis.
# ---------------------------------------------------------------------------
def _deform_kernel(xcol_ref, xg_ref, pw_ref, cwe_ref, shift_ref, out_ref,
                   off_ref, xoff_ref, *, H, W, Wg, C, KK, THW):
    f32 = jnp.float32
    t = pl.program_id(1)

    # All taps' p_conv offsets in ONE MXU push (bias + p_n folded in via the
    # ones row appended to the im2col slab).  Rows [0:KK] = x, [KK:2KK] = y.
    off_ref[...] = jnp.dot(pw_ref[...], xcol_ref[0], preferred_element_type=f32)

    xg = xg_ref[0]                                   # (C*Wg, H): xg[c*Wg+s, r] = x[c, r, s]

    # Loop-invariant: output-pixel coordinates of this HW tile (p_0 grid,
    # 1-based, matching the PyTorch reference) and the one-hot iotas.
    hw = t * THW + lax.broadcasted_iota(jnp.int32, (1, THW), 1)
    p0x = (hw // W + 1).astype(f32)
    p0y = (hw % W + 1).astype(f32)
    r_idx = lax.broadcasted_iota(jnp.int32, (H, 1), 0)
    s_idx = lax.broadcasted_iota(jnp.int32, (Wg, 1), 0)

    def tap(n, carry):
        # Sample position p = p_0 + p_n + offset (p_n pre-folded into the bias).
        p_x = p0x + off_ref[pl.ds(n, 1), :]
        p_y = p0y + off_ref[pl.ds(KK + n, 1), :]

        fl_x = jnp.floor(p_x)
        fl_y = jnp.floor(p_y)
        q_lt_x = jnp.clip(fl_x, 0.0, H - 1.0)
        q_rb_x = jnp.clip(fl_x + 1.0, 0.0, H - 1.0)
        q_lt_y = jnp.clip(fl_y, 0.0, W - 1.0)
        q_rb_y = jnp.clip(fl_y + 1.0, 0.0, W - 1.0)
        pxc = jnp.clip(p_x, 0.0, H - 1.0)
        pyc = jnp.clip(p_y, 0.0, W - 1.0)

        gx_lt = 1.0 + (q_lt_x - pxc)
        gx_rb = 1.0 - (q_rb_x - pxc)
        gy_lt = 1.0 + (q_lt_y - pyc)
        gy_rb = 1.0 - (q_rb_y - pyc)

        # Separable one-hot bilinear operators (H*THW + Wg*THW selects; no
        # (HW,HW) masks and no (W*C,THW) builds).
        rxT = (jnp.where(r_idx == q_lt_x.astype(jnp.int32), gx_lt, 0.0)
               + jnp.where(r_idx == q_rb_x.astype(jnp.int32), gx_rb, 0.0))   # (H, THW)
        ry = (jnp.where(s_idx == q_lt_y.astype(jnp.int32), gy_lt, 0.0)
              + jnp.where(s_idx == q_rb_y.astype(jnp.int32), gy_rb, 0.0))    # (Wg, THW)

        # Row (x) interpolation on the MXU: (C*Wg, H) @ (H, THW).
        u = jnp.dot(xg, rxT, preferred_element_type=f32)                     # (C*Wg, THW)
        # Column (y) interpolation + reduction over s (VPU/XLU); ry broadcast
        # over channels, so the select work is C-times smaller than before.
        v = u.reshape(C, Wg, THW) * ry[None, :, :]
        xoff_ref[pl.ds(pl.multiple_of(n * C, 8), C), :] = jnp.sum(v, axis=1)
        return carry

    lax.fori_loop(0, KK, tap, 0, unroll=3)

    # Fused conv (+ folded BN scale) over all taps: ONE (OC, KK*C)@(KK*C, THW).
    acc = jnp.dot(cwe_ref[...], xoff_ref[...], preferred_element_type=f32)
    # BN shift + ReLU, lane-dense store (last dim = THW, multiple of 128).
    out_ref[0] = jnp.maximum(acc + shift_ref[...], 0.0)


def deform_conv_bn_relu(x_nchw, p):
    """x_nchw: (B, C, H, W) f32 -> (B, OC, H, W) f32."""
    B, C, H, W = x_nchw.shape
    KK = 9
    OC = p["cwe"].shape[0]
    C_pad = _round_up(C, 8)                  # sublane-align channels
    Wg = _round_up(W, 8)                     # sublane-align gather width axis
    R = p["pw"].shape[1]                     # KK*C_pad + 1 (bias row), padded to 8
    assert R == _round_up(KK * C_pad + 1, 8)
    HW = H * W
    HW_pad = _round_up(HW, 128)
    if HW_pad % 512 == 0:
        thw = 512
    elif HW_pad % 256 == 0:
        thw = 256
    else:
        thw = 128
    n_t = HW_pad // thw

    xc = jnp.pad(x_nchw, ((0, 0), (0, C_pad - C), (0, 0), (0, 0)))

    # p_conv im2col slab (pad=1), lane-dense (B, R, HW_pad); last real row = 1
    # (bias), remaining rows zero.
    # TODO(synk): build this in-kernel from a padded (C, H+2, W+2) VMEM slab to
    #             cut the ~9x HBM re-read of the activations at large H*W.
    xz = jnp.pad(xc, ((0, 0), (0, 0), (1, 1), (1, 1)))
    patches = jnp.stack([xz[:, :, kr:kr + H, kc:kc + W]
                         for kr in range(3) for kc in range(3)], axis=1)
    xcol = patches.reshape(B, KK * C_pad, HW)
    ones_row = jnp.ones((B, 1, HW), jnp.float32)
    zero_rows = jnp.zeros((B, R - KK * C_pad - 1, HW), jnp.float32)
    xcol = jnp.concatenate([xcol, ones_row, zero_rows], axis=1)
    xcol = jnp.pad(xcol, ((0, 0), (0, 0), (0, HW_pad - HW)))

    # Gather operand: xg[b, c*Wg + s, r] = x[b, c, r, s] (zero columns s >= W).
    xg = jnp.transpose(xc, (0, 1, 3, 2))                        # (B, C_pad, W, H)
    xg = jnp.pad(xg, ((0, 0), (0, 0), (0, Wg - W), (0, 0)))
    xg = xg.reshape(B, C_pad * Wg, H)

    kernel = functools.partial(_deform_kernel, H=H, W=W, Wg=Wg, C=C_pad,
                               KK=KK, THW=thw)
    out = pl.pallas_call(
        kernel,
        out_shape=jax.ShapeDtypeStruct((B, OC, HW_pad), jnp.float32),
        grid_spec=pltpu.PrefetchScalarGridSpec(
            num_scalar_prefetch=0,
            grid=(B, n_t),
            in_specs=[
                pl.BlockSpec((1, R, thw), lambda b, t: (b, 0, t)),
                pl.BlockSpec((1, C_pad * Wg, H), lambda b, t: (b, 0, 0)),
                pl.BlockSpec((2 * KK, R), lambda b, t: (0, 0)),
                pl.BlockSpec((OC, KK * C_pad), lambda b, t: (0, 0)),
                pl.BlockSpec((OC, 1), lambda b, t: (0, 0)),
            ],
            out_specs=pl.BlockSpec((1, OC, thw), lambda b, t: (b, 0, t)),
            scratch_shapes=[
                pltpu.VMEM((2 * KK, thw), jnp.float32),       # all-tap offsets
                pltpu.VMEM((KK * C_pad, thw), jnp.float32),   # gathered x_offset
            ],
        ),
        compiler_params=pltpu.CompilerParams(
            dimension_semantics=("parallel", "parallel")),
        # Blocks here are KBs; raise vmem_limit_bytes only when THW / channels
        # grow (64 MiB total on v7x).
    )(xcol, xg, p["pw"], p["cwe"], p["shift"])
    return out[:, :, :HW].reshape(B, OC, H, W)


# ---------------------------------------------------------------------------
# Deterministic parameter construction (shapes per DeformConv2d.__init__).
# ---------------------------------------------------------------------------
def make_deform_conv_params(key, inc, outc, ks=3):
    KK = ks * ks
    C_pad = _round_up(inc, 8)
    R = _round_up(KK * C_pad + 1, 8)
    k_pb, k_cw = jax.random.split(key)
    bound = 1.0 / float(np.sqrt(inc * KK))

    # p_conv = Conv2d(inc, 2*KK, 3, padding=1): weight init'd to 0 per the
    # module; bias keeps PyTorch's default U(-1/sqrt(fan_in), 1/sqrt(fan_in)),
    # with the fixed kernel-grid offsets p_n folded in (p = p_0 + p_n + off).
    wp = np.zeros((2 * KK, inc, ks, ks), np.float32)
    bp = jax.random.uniform(k_pb, (2 * KK,), jnp.float32, -bound, bound)
    pn_x = np.repeat(np.arange(-(ks - 1) // 2, (ks - 1) // 2 + 1), ks)
    pn_y = np.tile(np.arange(-(ks - 1) // 2, (ks - 1) // 2 + 1), ks)
    bp = bp + jnp.asarray(np.concatenate([pn_x, pn_y]).astype(np.float32))
    # Pack as pw[row, m*C_pad + c] = wp[row, c, m//3, m%3]; last real column = bias.
    wp_packed = np.transpose(wp.reshape(2 * KK, inc, KK), (0, 2, 1))   # (2KK, KK, inc)
    wp_full = np.zeros((2 * KK, KK, C_pad), np.float32)
    wp_full[:, :, :inc] = wp_packed
    pw = jnp.zeros((2 * KK, R), jnp.float32)
    pw = pw.at[:, :KK * C_pad].set(jnp.asarray(wp_full.reshape(2 * KK, KK * C_pad)))
    pw = pw.at[:, KK * C_pad].set(bp)

    # main conv = Conv2d(inc, outc, 3, stride=3, bias=None); BatchNorm2d
    # (inference: gamma=1, beta=0, mean=0, var=1) scale folded into the weights.
    wc = jax.random.uniform(k_cw, (outc, inc, ks, ks), jnp.float32, -bound, bound)
    eps = 1e-5
    scale = 1.0 / np.sqrt(1.0 + eps)
    wcl = jnp.transpose(wc.reshape(outc, inc, KK), (0, 2, 1)) * scale  # (OC, KK, inc)
    wcl = jnp.pad(wcl, ((0, 0), (0, 0), (0, C_pad - inc)))
    cwe = wcl.reshape(outc, KK * C_pad)                                # (OC, KK*C_pad)
    shift = jnp.zeros((outc, 1), jnp.float32)
    return {"pw": pw, "cwe": cwe, "shift": shift}


# ---------------------------------------------------------------------------
# deform_up.forward
# ---------------------------------------------------------------------------
def deform_up_forward(x1, x2, params):
    """x1: (B, in_ch//2, H/2, W/2) NCHW,  x2: (B, in_ch//2, H, W) NCHW."""
    x1u = bilinear_up2x(x1)
    dY = x2.shape[2] - x1u.shape[2]
    dX = x2.shape[3] - x1u.shape[3]
    x1u = jnp.pad(x1u, ((0, 0), (0, 0),
                        (dY // 2, dY - dY // 2),
                        (dX // 2, dX - dX // 2)))
    x = jnp.concatenate([x2, x1u], axis=1)                # NCHW, in_ch channels
    x = deform_conv_bn_relu(x, params["dc1"])             # DeformConv2d + BN + ReLU
    x = deform_conv_bn_relu(x, params["dc2"])             # DeformConv2d + BN + ReLU
    return x


if __name__ == "__main__":
    key = jax.random.PRNGKey(0)
    k1, k2, kp1, kp2 = jax.random.split(key, 4)
    B, in_ch, out_ch = 2, 8, 4
    x1 = jax.random.normal(k1, (B, in_ch // 2, 8, 8), jnp.float32)
    x2 = jax.random.normal(k2, (B, in_ch // 2, 16, 16), jnp.float32)
    params = {
        "dc1": make_deform_conv_params(kp1, in_ch, out_ch),
        "dc2": make_deform_conv_params(kp2, out_ch, out_ch),
    }
    out = deform_up_forward(x1, x2, params)
    out = jax.block_until_ready(out)
    assert out.shape == (B, out_ch, 16, 16), out.shape
    assert bool(jnp.all(jnp.isfinite(out)))
    print("KERNEL_OK")
</pallas_src>

<mosaic_0001>
module attributes {stable_mosaic.version = 11 : i64} {
  func.func @_upsample_kernel(%arg0: i32, %arg1: i32, %arg2: memref<1x1x8x8xf32, #tpu.memory_space<vmem>>, %arg3: memref<16x8xf32, #tpu.memory_space<vmem>>, %arg4: memref<8x16xf32, #tpu.memory_space<vmem>>, %arg5: memref<1x1x16x16xf32, #tpu.memory_space<vmem>>) attributes {dimension_semantics = [#tpu.dimension_semantics<parallel>, #tpu.dimension_semantics<parallel>], iteration_bounds = array<i64: 2, 4>, scalar_prefetch = 0 : i64, scratch_operands = 0 : i64, tpu.core_type = #tpu.core_type<tc>, window_params = [{transform_indices = @transform_0, window_bounds = array<i64: 1, 1, 8, 8>}, {pipeline_mode = #tpu.pipeline_mode<synchronous>, transform_indices = @transform_1, window_bounds = array<i64: 16, 8>}, {pipeline_mode = #tpu.pipeline_mode<synchronous>, transform_indices = @transform_2, window_bounds = array<i64: 8, 16>}, {transform_indices = @transform_3, window_bounds = array<i64: 1, 1, 16, 16>}]} {
    %c0 = arith.constant 0 : index
    %c0_0 = arith.constant 0 : index
    %0 = vector.load %arg3[%c0, %c0_0] : memref<16x8xf32, #tpu.memory_space<vmem>>, vector<16x8xf32>
    %c0_1 = arith.constant 0 : index
    %c0_2 = arith.constant 0 : index
    %c0_3 = arith.constant 0 : index
    %c0_4 = arith.constant 0 : index
    %1 = vector.load %arg2[%c0_1, %c0_2, %c0_3, %c0_4] : memref<1x1x8x8xf32, #tpu.memory_space<vmem>>, vector<1x1x8x8xf32>
    %2 = vector.shape_cast %1 : vector<1x1x8x8xf32> to vector<8x8xf32>
    %cst = arith.constant dense<0.000000e+00> : vector<16x8xf32>
    %3 = tpu.matmul %0, %2, %cst {dimension_numbers = #tpu.dot_dimension_numbers<[1], [0], [0], [1], [0, 0, 1, 1], [], []>} : vector<16x8xf32>, vector<8x8xf32>, vector<16x8xf32> -> vector<16x8xf32>
    %c0_5 = arith.constant 0 : index
    %c0_6 = arith.constant 0 : index
    %4 = vector.load %arg4[%c0_5, %c0_6] : memref<8x16xf32, #tpu.memory_space<vmem>>, vector<8x16xf32>
    %cst_7 = arith.constant dense<0.000000e+00> : vector<16x16xf32>
    %5 = tpu.matmul %3, %4, %cst_7 {dimension_numbers = #tpu.dot_dimension_numbers<[1], [0], [0], [1], [0, 0, 1, 1], [], []>} : vector<16x8xf32>, vector<8x16xf32>, vector<16x16xf32> -> vector<16x16xf32>
    %c0_8 = arith.constant 0 : index
    %c0_9 = arith.constant 0 : index
    %c0_10 = arith.constant 0 : index
    %c0_11 = arith.constant 0 : index
    %6 = vector.load %arg5[%c0_8, %c0_9, %c0_10, %c0_11] : memref<1x1x16x16xf32, #tpu.memory_space<vmem>>, vector<1x1x16x16xf32>
    %7 = vector.shape_cast %6 : vector<1x1x16x16xf32> to vector<16x16xf32>
    %8 = vector.shape_cast %5 : vector<16x16xf32> to vector<1x1x16x16xf32>
    tpu.vector_store %arg5[%c0_8, %c0_9, %c0_10, %c0_11], %8 {strides = array<i32>} : memref<1x1x16x16xf32, #tpu.memory_space<vmem>>, vector<1x1x16x16xf32>,
    return
  }
  func.func @transform_0(%arg0: i32, %arg1: i32) -> (i32, i32, i32, i32) {
    %c0_i32 = arith.constant 0 : i32
    %c0_i32_0 = arith.constant 0 : i32
    %c0_i32_1 = arith.constant 0 : i32
    return %arg0, %arg1, %c0_i32, %c0_i32_0 : i32, i32, i32, i32
  }
  func.func @transform_1(%arg0: i32, %arg1: i32) -> (i32, i32) {
    %c0_i32 = arith.constant 0 : i32
    %c0_i32_0 = arith.constant 0 : i32
    %c0_i32_1 = arith.constant 0 : i32
    return %c0_i32, %c0_i32_0 : i32, i32
  }
  func.func @transform_2(%arg0: i32, %arg1: i32) -> (i32, i32) {
    %c0_i32 = arith.constant 0 : i32
    %c0_i32_0 = arith.constant 0 : i32
    %c0_i32_1 = arith.constant 0 : i32
    return %c0_i32, %c0_i32_0 : i32, i32
  }
  func.func @transform_3(%arg0: i32, %arg1: i32) -> (i32, i32, i32, i32) {
    %c0_i32 = arith.constant 0 : i32
    %c0_i32_0 = arith.constant 0 : i32
    %c0_i32_1 = arith.constant 0 : i32
    return %arg0, %arg1, %c0_i32, %c0_i32_0 : i32, i32, i32, i32
  }
}

</mosaic_0001>

<bundles_post_ra>
// kernel: tpu_custom_call.1
= control target key start
LH: loop header
LB: loop body
LE: loop exit
PB: predicated region body
PF: predicated region fallthrough
CT: control target
= control target key end

     0   :  { %8 = vsyncpa [#allocation3], 0  ;;  %s955_s0 = inlined_call_operand.hbm [shape: f32[2,4,8,8], index: 0, kind: input, shape index: {}]   ;;  %s956_s1 = inlined_call_operand.vmem [shape: f32[16,8], index: 1, kind: input, shape index: {}]   ;;  %s957_s2 = inlined_call_operand.vmem [shape: f32[8,16], index: 2, kind: input, shape index: {}]   ;;  %s958_s3 = inlined_call_operand.hbm [shape: f32[2,4,16,16], index: 3, kind: output, shape index: {}]  }
   0x1   :  { %10 = vsyncpa [#allocation3 + $0x1], 0 }
   0x2   :  { %11 = vsyncpa [#allocation4], 0 }
   0x3   :  { %13 = vsyncpa [#allocation4 + $0x1], 0  ;;  %s749_s12 = smov 0   ;;  %s751_s13 = smov 0  }
   0x4   :  { %s753_s14 = smov 0   ;;  %s755_s15 = smov 0  }
   0x5   :  { %s757_s16 = smov 0   ;;  %s759_s17 = smov 0  }
   0x6   :  { %s761_s18 = smov 0   ;;  %s763_s19 = smov 0  }
   0x7 LB: > { %s479_s20 = sadd.s32 4294967295, %s723_s19   ;;  %s480_s21 = sadd.s32 4294967294, %s723_s19   ;;  %s723_s19 = sphi %s763_s19, %s19_s19   ;;  %s719_s18 = sphi %s761_s18, %s975_s18   ;;  %s715_s17 = sphi %s759_s17, %s974_s17   ;;  %s711_s16 = sphi %s757_s16, %s973_s16   ;;  %s707_s15 = sphi %s755_s15, %s972_s15   ;;  %s703_s14 = sphi %s753_s14, %s971_s14   ;;  %s699_s13 = sphi %s751_s13, %s970_s13   ;;  %s695_s12 = sphi %s749_s12, %s969_s12  }
   0x8   : > { %s28_s22 = sadd.s32 1, %s715_s17  ;;  %s31_s23 = sadd.s32 1, %s719_s18 }
   0x9   : > { %p29_p0 = scmp.ge.s32.totalorder %s28_s22, 4  ;;  %s40_s24 = sadd.s32 1, %s703_s14 }
   0xa   : > { %p47_p1 = scmp.ne.s32.totalorder %s703_s14, %s699_s13  ;;  %p48_p2 = scmp.eq.s32.totalorder %s723_s19, 0 }
   0xb   : > { %s977_s22 = smov (%p29_p0, %s28_s22), 0  ;;  %s979_s23 = smov (!%p29_p0, %s31_s23), %s719_s18 }
   0xc   : > { %s36_s25 = ssub.s32 %s715_s17, %s977_s22  ;;  %p802_p3 = por %p48_p2, %p47_p1 }
   0xd   : > { %p33_p4 = scmp.ge.s32.totalorder %s979_s23, 2  ;;  %p53_p5 = scmp.ne.s32.totalorder %s699_s13, %s695_s12 }
   0xe   : > { %p54_p6 = scmp.eq.s32.totalorder %s479_s20, 0  ;;  %p121_p7 = scmp.eq.s32.totalorder %s479_s20, 7 }
   0xf   : > { %s981_s23 = smov (%p33_p4, %s979_s23), 0  ;;  %p127_p10 = scmp.eq.s32.totalorder %s480_s21, 7 }
  0x10   : > { %p810_p8 = por %p54_p6, %p53_p5  ;;  %p814_p9 = por %p121_p7, %p47_p1 }
  0x11   : > { %s35_s29 = ssub.s32 %s719_s18, %s981_s23  ;;  %p820_p12 = por %p127_p10, %p53_p5 }
  0x12   : > { %s962_s28 = scalar_select %p814_p9, 1, 0 }
  0x13   : > { %s37_s30 = sor.u32 %s36_s25, %s35_s29  ;;  %p527_p13 = scmp.lt.s32.totalorder %s723_s19, 8 }
  0x14   : > { %p38_p11 = scmp.eq.s32.totalorder %s37_s30, 0  ;;  %s153_s5 = sand.u32 1, %s703_s14  }
  0x15   : > { %s963_s4 = scalar_select %p820_p12, 1, 0 }
  0x16   : > { %s827_s6 = scalar_select %p38_p11, %s703_s14, %s40_s24  }
  0x17   : > { %s483_s7 = sshll.u32 %s153_s5, 3  ;;  %s484_s8 = sshll.u32 %s719_s18, 2 }
  0x18   : > { %s162_s9 = sadd.s32 %s715_s17, %s484_s8  ;;  %s157_s10 = scalar_lea.vmem [#allocation2], %s483_s7 }
  0x19   : > { %s166_s11 = sshll.u32 %s157_s10, 4  ;;  %s485_s20 = sshll.u32 %s162_s9, 7  ;;  %s831_s11 = int_to_ptr.vmem [resolvable:$true] %s166_s11 }
  0x1a   : > { %s836_s29 = scalar_lea.hbm %s955_s0, %s485_s20  ;;  %p840_p0 = pnand %p527_p13, %p802_p3 }
  0x1b   : > { %s154_s30 = scalar_lea.sflag [#allocation3], %s153_s5  ;;  %s595_s7 = scalar_lea.hbm %s836_s29, 128 }
  0x1c   : > { %p596_p4 = scmp.ne.s32.totalorder %s836_s29, %s595_s7  ;;  %p597_p5 = pneg %p840_p0 }
  0x1d   : > { %s600_s9 = scalar_lea.hbm %s955_s0, 1024  ;;  %p601_p3 = scmp.lt.u32.totalorder %s836_s29, %s955_s0 }
  0x1e   : > { %p598_p6 = pnand %p597_p5, %p596_p4  ;;  %p602_p10 = scmp.lt.u32.totalorder %s600_s9, %s595_s7 }
  0x1f   : > { %p604_p13 = scmp.lt.u32.totalorder %s595_s7, %s836_s29 }
  0x20   : > { %p599_p7 = pneg %p598_p6  ;;  %p603_p11 = por %p602_p10, %p601_p3 }
  0x22   : > { %p605_p1 = por %p604_p13, %p603_p11 }
  0x24   : > { %p606_p2 = pnand %p605_p1, %p599_p7 }
  0x26   : > { %609 = shalt.err (!%p606_p2)
}
  0x27   : > { %s610_s5 = scalar_lea.vmem %s831_s11, 128  ;;  %s725_s21 = smov [#allocation2]  }
  0x28   : > { %p611_p4 = scmp.ne.s32.totalorder %s831_s11, %s610_s5  ;;  %s615_s25 = sshll.u32 %s725_s21, 4  ;;  %s616_s25 = int_to_ptr.vmem [resolvable:$false] %s615_s25 }
  0x29   : > { %s617_s26 = scalar_lea.vmem %s616_s25, 256  ;;  %p618_p9 = scmp.lt.s32.totalorder %s831_s11, %s616_s25 }
  0x2a   : > { %p613_p6 = pnand %p611_p4, %p597_p5  ;;  %p619_p3 = scmp.lt.s32.totalorder %s617_s26, %s610_s5 }
  0x2c   : > { %p614_p12 = pneg %p613_p6  ;;  %p620_p10 = por %p619_p3, %p618_p9 }
  0x2e   : > { %p621_p11 = pnand %p620_p10, %p614_p12 }
  0x30   : > { %624 = shalt.err (!%p621_p11)
}
  0x31   : > { %522 = dma.hbm_to_vmem [thread:$0]  (!%p840_p0), %s836_s29, 128, %s831_s11, %s154_s30  }
  0x32   : > { %p965_p1 = scmp.lt.s32.totalorder %s723_s19, 9  ;;  %p966_p2 = scmp.ge.s32.totalorder %s723_s19, 1 }
  0x34   : > { %p172_p5 = pnand %p966_p2, %p965_p1 }
  0x35   : > { %s876_s7 = sand.u32 (!%p172_p5), 1, %s699_s13  }
  0x36   : > { %175 = sbr.rel (%p172_p5) target bundleno = 507 (0x1fb), region = 32  ;;  %s487_s8 = sshll.u32 (!%p172_p5), %s876_s7, 3 }
  0x37   : > { %s178_s9 = scalar_lea.sflag (!%p172_p5), [#allocation3], %s876_s7  ;;  %s181_s10 = scalar_lea.vmem (!%p172_p5), [#allocation2], %s487_s8 }
  0x3d   : > { %686 = dma.done.wait (%p810_p8), %s178_s9, 128  }
  0x3e   : > { %688 = vsyncadd (%p810_p8), %s178_s9, 4294967168  ;;  %vm207_vm0 = vcmask 64512   ;;  %v206_v0 = vld [vmem:[%s181_s10] sm:$0xff]  ;;  %s488_s5 = sshll.u32 %s876_s7, 4  ;;  %s494_s21 = sshll.u32 %s707_s15, 1  ;;  %vm371_vm1 = vcmask 130048  }
  0x3f   : > { %v204_v1 = vld [vmem:[%s956_s1] sm:$0xff]  ;;  %v205_v2 = vld [vmem:[%s956_s1 + $0x8] sm:$0xff]  ;;  %505 = vmatprep.subr.mxu0 %v206_v0  ;;  %s495_s25 = sshll.u32 %s711_s16, 3  ;;  %s203_s8 = scalar_lea.vmem [#allocation5], %s488_s5 }
  0x40   : > { %507 = vmatprep.mubr.msk.f32.mxu0 %vm207_vm0, %v204_v1  ;;  %506 = vmatpush3.msra.mxu0 %v206_v0  ;;  %v289_v3 = vld [vmem:[%s957_s2] sm:$0xff]  ;;  %s387_s26 = sadd.s32 %s495_s25, %s494_s21  ;;  %s390_s9 = sshll.u32 %s203_s8, 4  ;;  %s896_s9 = int_to_ptr.vmem [resolvable:$true] %s390_s9 }
  0x41   : > { %508 = vmatmul.mubr.msk.f32.vlgmr.msra.gmra.mrb[0].mxu0 %vm207_vm0, %v205_v2  ;;  %510 = vmatprep.subr.mxu1 %v289_v3  ;;  %s496_s10 = sshll.u32 %s387_s26, 7  ;;  %s375_s15 = scalar_lea.sflag [#allocation4], %s876_s7 }
  0x42   : > { %511 = vmatpush3.msra.mxu1 %v289_v3  ;;  %s901_s24 = scalar_lea.hbm %s958_s3, %s496_s10  ;;  %s625_s16 = scalar_lea.vmem %s896_s9, 256 }
  0x43   : > { %p626_p8 = scmp.ne.s32.totalorder %s896_s9, %s625_s16  ;;  %p967_p9 = scmp.ne.s32.totalorder %s962_s28, 0 }
  0x44   : > { %s726_s30 = smov [#allocation5]  }
  0x45   : > { %p627_p12 = pnand %p626_p8, %p967_p9  ;;  %s629_s20 = sshll.u32 %s726_s30, 4  ;;  %s630_s20 = int_to_ptr.vmem [resolvable:$false] %s629_s20 }
  0x46   : > { %s631_s27 = scalar_lea.vmem %s630_s20, 512  ;;  %p632_p7 = scmp.lt.s32.totalorder %s896_s9, %s630_s20 }
  0x47   : > { %p628_p0 = pneg %p627_p12  ;;  %p633_p13 = scmp.lt.s32.totalorder %s631_s27, %s625_s16 }
  0x49   : > { %p634_p4 = por %p633_p13, %p632_p7 }
  0x4b   : > { %p635_p6 = pnand %p634_p4, %p628_p0 }
 0x114   : > { %v509_v4 = vpop.f32.mrb[0].mxu0 }
 0x115   : > { %v280_v5 = vpop.f32.mrb[1].mxu0 }
 0x116   : > { %512 = vmatprep.mubr.msk.f32.mxu1 %vm207_vm0, %v280_v5 }
 0x117   : > { %513 = vmatmul.mubr.msk.f32.vlgmr.msra.gmra.mrb[0].mxu1 %vm207_vm0, %v509_v4 }
 0x1ea   : > { %v514_v6 = vpop.f32.mrb[0].mxu1 }
 0x1eb   : > { %373 = vst.msk [vmem:[%s203_s8 + $0x8] sm:$0xff] %vm371_vm1, %v514_v6  ;;  %v362_v7 = vpop.f32.mrb[1].mxu1 }
 0x1ec   : > { %372 = vst.msk [vmem:[%s203_s8] sm:$0xff] %vm371_vm1, %v362_v7 }
 0x1ed   : > { %638 = shalt.err (!%p635_p6)
}
 0x1ee   : > { %s639_s5 = scalar_lea.hbm %s901_s24, 256  ;;  %s643_s26 = scalar_lea.hbm %s958_s3, 2048 }
 0x1ef   : > { %p640_p3 = scmp.ne.s32.totalorder %s901_s24, %s639_s5  ;;  %p644_p1 = scmp.lt.u32.totalorder %s901_s24, %s958_s3 }
 0x1f0   : > { %p645_p2 = scmp.lt.u32.totalorder %s643_s26, %s639_s5  ;;  %p647_p8 = scmp.lt.u32.totalorder %s639_s5, %s901_s24 }
 0x1f1   : > { %p641_p10 = pnand %p640_p3, %p967_p9 }
 0x1f2   : > { %p646_p5 = por %p645_p2, %p644_p1 }
 0x1f3   : > { %p642_p11 = pneg %p641_p10 }
 0x1f4   : > { %p648_p12 = por %p647_p8, %p646_p5 }
 0x1f6   : > { %p649_p0 = pnand %p648_p12, %p642_p11 }
 0x1f8   : > { %652 = shalt.err (!%p649_p0)
}
 0x1f9   : > { %s727_s11 = smov 128   ;;  %s728_s29 = smov 8  }
 0x1fa   : > { %517 = dma.vmem_to_hbm [thread:$0]  (%p967_p9), %s896_s9, 256, %s901_s24, %s375_s15, %s727_s11, %s727_s11, %s728_s29  }
 0x1fb PF: > { %p528_p7 = scmp.ge.s32.totalorder %s723_s19, 2  ;;  %s405_s16 = sand.u32 1, %s695_s12  }
 0x1fc   : > { %p968_p13 = scmp.ne.s32.totalorder %s963_s4, 0  ;;  %s406_s30 = scalar_lea.sflag [#allocation4], %s405_s16 }
 0x1fe   : > { %p524_p4 = pnand %p528_p7, %p968_p13 }
 0x200   : > { %690 = dma.done.wait (!%p524_p4), %s406_s30, 256  }
 0x201   : > { %692 = vsyncadd (!%p524_p4), %s406_s30, 4294967040  ;;  %s19_s19 = sadd.s32 1, %s723_s19   ;;  %s969_s12 = smov %s699_s13 }
 0x202   : > { %p16_p6 = scmp.ge.s32.totalorder %s19_s19, 10   ;;  %s970_s13 = smov %s703_s14 }
 0x203   : > { %s971_s14 = smov %s827_s6  ;;  %s972_s15 = smov %s715_s17 }
 0x204   : > { %s973_s16 = smov %s719_s18  ;;  %s974_s17 = smov %s977_s22 }
 0x205   : > { %s975_s18 = smov %s981_s23  ;;  %18 = sbr.rel (!%p16_p6) target bundleno = 7 (0x7), region = 77 }
 0x20c   :  { %411 = vsyncpa [#allocation3], 1 }
 0x20d   :  { %413 = vsyncpa [#allocation3 + $0x1], 1 }
 0x20e   :  { %414 = vsyncpa [#allocation4], 1 }
 0x20f   :  { %416 = vsyncpa [#allocation4 + $0x1], 1 }

</bundles_post_ra>
